<compile_context>
chip_gen: v5e
topology: v5e:2x2
jax: 0.10.0
libtpu: 0.0.40
codegen_flags: <defaults>
</compile_context>

<pallas_src>
import jax
import jax.numpy as jnp
import numpy as np
from jax.experimental import pallas as pl
from jax.experimental.pallas import tpu as pltpu


def _embed_kernel(x_ref, w_ref, pos_ref, out_ref):
    """One grid step: TB whole images worth of tokens.

    x_ref:   (TB, T, P) bf16 patches; row 0 of every image is all-zeros (cls row)
    w_ref:   (P, E)     bf16 projection weight (resident across the grid)
    pos_ref: (T, E)     f32 additive table: row 0 = cls_token + pos[0],
                        rows 1.. = conv_bias + pos[1:]
    out_ref: (TB, T, E) f32 token matrix (cls token already in place)
    """
    w = w_ref[...]
    pos = pos_ref[...]
    for b in range(x_ref.shape[0]):   # static unroll; TB is small
        y = jnp.dot(x_ref[b], w, preferred_element_type=jnp.float32)  # MXU, f32 acc
        out_ref[b] = (y + pos).astype(out_ref.dtype)


def _pick_block_b(batch, tokens, p, e, budget_bytes=8 << 20, max_rows=512):
    """Largest divisor of `batch` whose (double-buffered) tiles fit the budget."""
    resident = p * e * 2 + tokens * e * 4                  # bf16 weight + f32 table
    per_image = 2 * tokens * p * 2 + 2 * tokens * e * 4    # dbl-buffered in + out
    best = 1
    for tb in range(1, batch + 1):
        if batch % tb:
            continue
        if tb > 1 and tb * tokens > max_rows:
            continue
        if resident + tb * per_image <= budget_bytes:
            best = tb
    return best


def patch_embed_pallas(patches, w_t, pos_plus, block_b):
    """patches: (B, T, P) bf16, w_t: (P, E) bf16, pos_plus: (T, E) f32."""
    B, T, P = patches.shape
    E = w_t.shape[1]
    return pl.pallas_call(
        _embed_kernel,
        out_shape=jax.ShapeDtypeStruct((B, T, E), jnp.float32),
        grid_spec=pltpu.PrefetchScalarGridSpec(
            num_scalar_prefetch=0,
            grid=(B // block_b,),
            in_specs=[
                pl.BlockSpec((block_b, T, P), lambda i: (i, 0, 0)),
                pl.BlockSpec((P, E), lambda i: (0, 0)),      # resident
                pl.BlockSpec((T, E), lambda i: (0, 0)),      # resident
            ],
            out_specs=pl.BlockSpec((block_b, T, E), lambda i: (i, 0, 0)),
        ),
        compiler_params=pltpu.CompilerParams(
            dimension_semantics=("parallel",),
            vmem_limit_bytes=32 * 1024 * 1024,
        ),
    )(patches, w_t, pos_plus)


class EmbeddingLayerPallas:
    """JAX/Pallas port of the PyTorch EmbeddingLayer (ViT patch embedding)."""

    def __init__(self, img_size, patch_size, in_channels, embed_dim, key):
        self.in_channels = in_channels
        self.patch_size = patch_size
        self.embed_dim = embed_dim
        self.num_patches = (img_size // patch_size) ** 2

        k1, k2, k3, k4 = jax.random.split(key, 4)
        # Conv2d(in_channels, embed_dim, kernel=patch, stride=patch) params.
        # Deterministic synthetic init (stand-in for trunc_normal_ / kaiming).
        self.proj_w = (
            jax.random.normal(
                k1, (embed_dim, in_channels, patch_size, patch_size), jnp.float32
            )
            * 0.02
        )
        self.proj_b = jax.random.normal(k2, (embed_dim,), jnp.float32) * 0.02
        self.cls_token = jax.random.normal(k3, (1, 1, embed_dim), jnp.float32) * 0.02
        self.pos_embed = (
            jax.random.normal(k4, (1, self.num_patches + 1, embed_dim), jnp.float32)
            * 0.02
        )

        # --- Precomputed, layout-friendly kernel parameters (hoisted out of
        # __call__): channels-last flattened weight in bf16, and the additive
        # table with conv bias + cls token + positional embedding folded in.
        P = in_channels * patch_size * patch_size
        w_khwc = jnp.transpose(self.proj_w, (0, 2, 3, 1)).reshape(embed_dim, P)
        self.w_t_bf16 = jnp.asarray(w_khwc.T, dtype=jnp.bfloat16)        # (P, E)
        pos = self.pos_embed[0]                                          # (N+1, E)
        self.pos_plus = jnp.concatenate(
            [self.cls_token[0, 0][None, :] + pos[0:1],                   # cls row
             self.proj_b[None, :] + pos[1:]],                            # patch rows
            axis=0,
        ).astype(jnp.float32)                                            # (N+1, E)

    def __call__(self, x):
        ps = self.patch_size
        if x.ndim == 4 and x.shape[-1] == self.in_channels:
            # NHWC fast path: channels stay in the minor (lane) dim — patch
            # extraction is a cheap sublane-only shuffle, no channel permute.
            B, H, W, C = x.shape
            nh, nw = H // ps, W // ps
            p = x.reshape(B, nh, ps, nw, ps, C)
            p = jnp.transpose(p, (0, 1, 3, 2, 4, 5))        # (B, nh, nw, kh, kw, C)
        else:
            # NCHW (PyTorch default) — one transpose to channels-last patches.
            B, C, H, W = x.shape
            nh, nw = H // ps, W // ps
            p = x.reshape(B, C, nh, ps, nw, ps)
            p = jnp.transpose(p, (0, 2, 4, 3, 5, 1))        # (B, nh, nw, kh, kw, C)
        N = nh * nw
        P = C * ps * ps
        patches = p.reshape(B, N, P)
        # Prepend one zero "cls patch" per image: row @ W == 0, and the folded
        # additive table supplies cls_token + pos[0] for that row, so the kernel
        # emits the full (B, N+1, E) output with no concatenate afterwards.
        patches = jnp.pad(patches, ((0, 0), (1, 0), (0, 0)))
        patches = patches.astype(jnp.bfloat16)

        T = N + 1
        block_b = _pick_block_b(B, T, P, self.embed_dim)
        return patch_embed_pallas(patches, self.w_t_bf16, self.pos_plus, block_b)


def _reference_forward(layer, x):
    """Pure-JAX f32 reference matching the PyTorch forward semantics."""
    if x.ndim == 4 and x.shape[-1] == layer.in_channels:
        x = jnp.transpose(x, (0, 3, 1, 2))
    y = jax.lax.conv_general_dilated(
        x,
        layer.proj_w,
        window_strides=(layer.patch_size, layer.patch_size),
        padding="VALID",
        dimension_numbers=("NCHW", "OIHW", "NCHW"),
    ) + layer.proj_b[None, :, None, None]
    B = x.shape[0]
    y = y.reshape(B, layer.embed_dim, -1).transpose(0, 2, 1)  # (B, N, E)
    cls = jnp.broadcast_to(layer.cls_token, (B, 1, layer.embed_dim))
    y = jnp.concatenate([cls, y], axis=1)
    return y + layer.pos_embed


if __name__ == "__main__":
    key = jax.random.PRNGKey(0)
    k_param, k_x = jax.random.split(key)

    img_size, patch_size, in_channels, embed_dim = 16, 4, 4, 32
    batch = 2

    layer = EmbeddingLayerPallas(img_size, patch_size, in_channels, embed_dim, k_param)

    # NHWC input exercises the no-permute fast path (the module accepts both).
    x_nhwc = jax.random.normal(k_x, (batch, img_size, img_size, in_channels),
                               jnp.float32)

    out = jax.block_until_ready(layer(x_nhwc))
    assert out.shape == (batch, layer.num_patches + 1, embed_dim), out.shape

    # bf16 matmul inputs vs f32 conv reference → loose-ish tolerance.
    ref = jax.block_until_ready(_reference_forward(layer, x_nhwc))
    np.testing.assert_allclose(np.asarray(out), np.asarray(ref), rtol=2e-2, atol=1e-2)

    # NCHW path must agree with the NHWC path exactly (same patches, same kernel).
    x_nchw = jnp.transpose(x_nhwc, (0, 3, 1, 2))
    out2 = jax.block_until_ready(layer(x_nchw))
    np.testing.assert_allclose(np.asarray(out2), np.asarray(out), rtol=1e-6, atol=1e-6)

    print("KERNEL_OK")
</pallas_src>

<mosaic_0001>
module attributes {stable_mosaic.version = 11 : i64} {
  func.func @_embed_kernel(%arg0: i32, %arg1: memref<2x17x64xbf16, #tpu.memory_space<vmem>>, %arg2: memref<64x32xbf16, #tpu.memory_space<vmem>>, %arg3: memref<17x32xf32, #tpu.memory_space<vmem>>, %arg4: memref<2x17x32xf32, #tpu.memory_space<vmem>>) attributes {dimension_semantics = [#tpu.dimension_semantics<parallel>], iteration_bounds = array<i64: 1>, scalar_prefetch = 0 : i64, scratch_operands = 0 : i64, tpu.core_type = #tpu.core_type<tc>, window_params = [{transform_indices = @transform_0, window_bounds = array<i64: 2, 17, 64>}, {pipeline_mode = #tpu.pipeline_mode<synchronous>, transform_indices = @transform_1, window_bounds = array<i64: 64, 32>}, {pipeline_mode = #tpu.pipeline_mode<synchronous>, transform_indices = @transform_2, window_bounds = array<i64: 17, 32>}, {transform_indices = @transform_3, window_bounds = array<i64: 2, 17, 32>}]} {
    %c0 = arith.constant 0 : index
    %c0_0 = arith.constant 0 : index
    %0 = vector.load %arg2[%c0, %c0_0] : memref<64x32xbf16, #tpu.memory_space<vmem>>, vector<64x32xbf16>
    %c0_1 = arith.constant 0 : index
    %c0_2 = arith.constant 0 : index
    %1 = vector.load %arg3[%c0_1, %c0_2] : memref<17x32xf32, #tpu.memory_space<vmem>>, vector<17x32xf32>
    %c0_3 = arith.constant 0 : index
    %c0_4 = arith.constant 0 : index
    %c0_5 = arith.constant 0 : index
    %2 = vector.load %arg1[%c0_3, %c0_4, %c0_5] : memref<2x17x64xbf16, #tpu.memory_space<vmem>>, vector<1x17x64xbf16>
    %3 = vector.shape_cast %2 : vector<1x17x64xbf16> to vector<17x64xbf16>
    %cst = arith.constant dense<0.000000e+00> : vector<17x32xf32>
    %4 = tpu.matmul %3, %0, %cst {dimension_numbers = #tpu.dot_dimension_numbers<[1], [0], [0], [1], [0, 0, 1, 1], [], []>} : vector<17x64xbf16>, vector<64x32xbf16>, vector<17x32xf32> -> vector<17x32xf32>
    %5 = arith.addf %4, %1 : vector<17x32xf32>
    %c0_6 = arith.constant 0 : index
    %c0_7 = arith.constant 0 : index
    %c0_8 = arith.constant 0 : index
    %6 = vector.load %arg4[%c0_6, %c0_7, %c0_8] : memref<2x17x32xf32, #tpu.memory_space<vmem>>, vector<1x17x32xf32>
    %7 = vector.shape_cast %6 : vector<1x17x32xf32> to vector<17x32xf32>
    %8 = vector.shape_cast %5 : vector<17x32xf32> to vector<1x17x32xf32>
    tpu.vector_store %arg4[%c0_6, %c0_7, %c0_8], %8 {strides = array<i32>} : memref<2x17x32xf32, #tpu.memory_space<vmem>>, vector<1x17x32xf32>,
    %c1 = arith.constant 1 : index
    %c0_9 = arith.constant 0 : index
    %c0_10 = arith.constant 0 : index
    %9 = vector.load %arg1[%c1, %c0_9, %c0_10] : memref<2x17x64xbf16, #tpu.memory_space<vmem>>, vector<1x17x64xbf16>
    %10 = vector.shape_cast %9 : vector<1x17x64xbf16> to vector<17x64xbf16>
    %cst_11 = arith.constant dense<0.000000e+00> : vector<17x32xf32>
    %11 = tpu.matmul %10, %0, %cst_11 {dimension_numbers = #tpu.dot_dimension_numbers<[1], [0], [0], [1], [0, 0, 1, 1], [], []>} : vector<17x64xbf16>, vector<64x32xbf16>, vector<17x32xf32> -> vector<17x32xf32>
    %12 = arith.addf %11, %1 : vector<17x32xf32>
    %c1_12 = arith.constant 1 : index
    %c0_13 = arith.constant 0 : index
    %c0_14 = arith.constant 0 : index
    %13 = vector.load %arg4[%c1_12, %c0_13, %c0_14] : memref<2x17x32xf32, #tpu.memory_space<vmem>>, vector<1x17x32xf32>
    %14 = vector.shape_cast %13 : vector<1x17x32xf32> to vector<17x32xf32>
    %15 = vector.shape_cast %12 : vector<17x32xf32> to vector<1x17x32xf32>
    tpu.vector_store %arg4[%c1_12, %c0_13, %c0_14], %15 {strides = array<i32>} : memref<2x17x32xf32, #tpu.memory_space<vmem>>, vector<1x17x32xf32>,
    return
  }
  func.func @transform_0(%arg0: i32) -> (i32, i32, i32) {
    %c0_i32 = arith.constant 0 : i32
    %c0_i32_0 = arith.constant 0 : i32
    %c0_i32_1 = arith.constant 0 : i32
    return %arg0, %c0_i32, %c0_i32_0 : i32, i32, i32
  }
  func.func @transform_1(%arg0: i32) -> (i32, i32) {
    %c0_i32 = arith.constant 0 : i32
    %c0_i32_0 = arith.constant 0 : i32
    %c0_i32_1 = arith.constant 0 : i32
    return %c0_i32, %c0_i32_0 : i32, i32
  }
  func.func @transform_2(%arg0: i32) -> (i32, i32) {
    %c0_i32 = arith.constant 0 : i32
    %c0_i32_0 = arith.constant 0 : i32
    %c0_i32_1 = arith.constant 0 : i32
    return %c0_i32, %c0_i32_0 : i32, i32
  }
  func.func @transform_3(%arg0: i32) -> (i32, i32, i32) {
    %c0_i32 = arith.constant 0 : i32
    %c0_i32_0 = arith.constant 0 : i32
    %c0_i32_1 = arith.constant 0 : i32
    return %arg0, %c0_i32, %c0_i32_0 : i32, i32, i32
  }
}

</mosaic_0001>

<bundles_post_ra>
// kernel: tpu_custom_call.1
= control target key start
LH: loop header
LB: loop body
LE: loop exit
PB: predicated region body
PF: predicated region fallthrough
CT: control target
= control target key end

     0   :  { %vm61_vm0 = vcmask 523264   ;;  %vm86_vm1 = vcmask 261120   ;;  %vm89_vm2 = vcmask 253952   ;;  %s258_s1 = inlined_call_operand.vmem [shape: bf16[64,32], index: 1, kind: input, shape index: {}]   ;;  %s259_s0 = inlined_call_operand.vmem [shape: bf16[2,17,64], index: 0, kind: input, shape index: {}]   ;;  %s260_s2 = inlined_call_operand.vmem [shape: f32[17,32], index: 2, kind: input, shape index: {}]   ;;  %s261_s3 = inlined_call_operand.vmem [shape: f32[2,17,32], index: 3, kind: output, shape index: {}]  }
   0x1   :  { %v172_v0 = vld [vmem:[%s258_s1 + $0x18] sm:$0xff]  ;;  %v171_v1 = vld [vmem:[%s258_s1 + $0x10] sm:$0xff]  ;;  %v170_v2 = vld [vmem:[%s258_s1 + $0x8] sm:$0xff] }
   0x2   :  { %72 = vmatpush.bf16.msra.mxu0 %v172_v0  ;;  %175 = vmatpush.bf16.msra.mxu2 %v172_v0  ;;  %v28_v3 = vld [vmem:[%s259_s0 + $0x8] sm:$0x1]  ;;  %v159_v4 = vld [vmem:[%s259_s0 + $0x14] sm:$0x1]  ;;  %v169_v6 = vld [vmem:[%s258_s1] sm:$0xff] }
   0x3   :  { %113 = vmatpush.bf16.msra.mxu1 %v172_v0  ;;  %179 = vmatpush.bf16.msra.mxu3 %v172_v0  ;;  %v34_v5 = vunpack.c.l.b16 %v28_v3  ;;  %v100_v7 = vunpack.c.l.b16 %v159_v4  ;;  %v173_v8 = vld [vmem:[%s259_s0] sm:$0xff]  ;;  %v174_v10 = vld [vmem:[%s259_s0 + $0xc] sm:$0xff] }
   0x4   :  { %v23_v12 = vld [vmem:[%s260_s2] sm:$0xff]  ;;  %v25_v17 = vld [vmem:[%s260_s2 + $0x10] sm:$0x1]  ;;  %v24_v19 = vld [vmem:[%s260_s2 + $0x8] sm:$0xff] }
   0x5   :  { %v36_v9 = vpack.c.b16 %v34_v5, %v34_v5  ;;  %v102_v11 = vpack.c.b16 %v100_v7, %v100_v7 }
   0x6   :  { %73 = vmatpush.bf16.msra.mxu0 %v171_v1  ;;  %176 = vmatpush.bf16.msra.mxu2 %v171_v1 }
   0x7   :  { %114 = vmatpush.bf16.msra.mxu1 %v171_v1  ;;  %180 = vmatpush.bf16.msra.mxu3 %v171_v1 }
   0xa   :  { %74 = vmatpush.bf16.msra.mxu0 %v170_v2  ;;  %177 = vmatpush.bf16.msra.mxu2 %v170_v2 }
   0xb   :  { %115 = vmatpush.bf16.msra.mxu1 %v170_v2  ;;  %181 = vmatpush.bf16.msra.mxu3 %v170_v2 }
   0xe   :  { %75 = vmatpush.bf16.msra.mxu0 %v169_v6  ;;  %178 = vmatpush.bf16.msra.mxu2 %v169_v6 }
   0xf   :  { %116 = vmatpush.bf16.msra.mxu1 %v169_v6  ;;  %182 = vmatpush.bf16.msra.mxu3 %v169_v6 }
  0x11   :  { %155 = vmatmul.msk.bf16.vlgmr.msra.gmra.mxu0 %vm61_vm0, %v173_v8  ;;  %156 = vmatmul.msk.bf16.vlgmr.msra.gmra.mxu2 %vm61_vm0, %v36_v9 }
  0x12   :  { %164 = vmatmul.msk.bf16.vlgmr.msra.gmra.mxu1 %vm61_vm0, %v174_v10  ;;  %165 = vmatmul.msk.bf16.vlgmr.msra.gmra.mxu3 %vm61_vm0, %v102_v11 }
  0x8e   :  { %v77_v13 = vpop.f32.mrf.mxu0 }
  0x8f   :  { %v78_v14 = vadd.f32 %v77_v13, %v23_v12  ;;  %v118_v15 = vpop.f32.mrf.mxu1 }
  0x90   :  { %v119_v16 = vadd.f32 %v118_v15, %v23_v12 }
  0x91   :  { %87 = vst.msk [vmem:[%s261_s3] sm:$0xff] %vm86_vm1, %v78_v14 }
  0x92   :  { %166 = vst.msk [vmem:[%s261_s3 + $0x18] sm:$0xff] %vm86_vm1, %v119_v16 }
  0x94   :  { %v82_v18 = vpop.f32.mrf.mxu2 }
  0x95   :  { %v83_v20 = vadd.f32 %v82_v18, %v25_v17  ;;  %v123_v21 = vpop.f32.mrf.mxu3 }
  0x96   :  { %v124_v22 = vadd.f32 %v123_v21, %v25_v17  ;;  %v79_v23 = vpop.f32.mrf.mxu0 }
  0x97   :  { %90 = vst.msk [vmem:[%s261_s3 + $0x10] sm:$0x1] %vm89_vm2, %v83_v20  ;;  %v80_v24 = vadd.f32 %v79_v23, %v24_v19  ;;  %v120_v25 = vpop.f32.mrf.mxu1 }
  0x98   :  { %168 = vst.msk [vmem:[%s261_s3 + $0x28] sm:$0x1] %vm89_vm2, %v124_v22  ;;  %v121_v26 = vadd.f32 %v120_v25, %v24_v19 }
  0x99   :  { %88 = vst.msk [vmem:[%s261_s3 + $0x8] sm:$0xff] %vm86_vm1, %v80_v24 }
  0x9a   :  { %167 = vst.msk [vmem:[%s261_s3 + $0x20] sm:$0xff] %vm86_vm1, %v121_v26 }
  0x9c   :  { %v84_v27 = vpop.f32.mrf.mxu2 }
  0x9d   :  { %v125_v28 = vpop.f32.mrf.mxu3 }

</bundles_post_ra>
